<compile_context>
chip_gen: v5e
topology: v5e:2x2
jax: 0.10.0
libtpu: 0.0.40
codegen_flags: <defaults>
</compile_context>

<pallas_src>
import functools

import jax
import jax.numpy as jnp
import numpy as np
from jax.experimental import pallas as pl
from jax.experimental.pallas import tpu as pltpu


_LANES = 128
_SUBLANES = 8
# Keep the full (padded) weight matrix resident in VMEM below this size;
# otherwise tile it along the vocab axis like x.
_W_RESIDENT_MAX_BYTES = 4 * 1024 * 1024
# Finite "minus infinity" for padded label columns: exp(x - max) underflows to
# exactly 0.0f, and unlike -inf it can never produce NaN if the epilogue is
# ever changed to use multiplicative masks.
_NEG_SENTINEL = -1e30


def _round_up(x: int, m: int) -> int:
    return ((x + m - 1) // m) * m


def _logreg_kernel(x_ref, w_ref, b_ref, o_ref, *, tk, w_resident):
    # Grid: (batch tiles [parallel], vocab tiles [arbitrary reduction]).
    # x_ref: (TB, TK) f32/bf16, w_ref: (V_pad, L_pad) or (TK, L_pad) bf16,
    # b_ref: (1, L_pad) f32, o_ref: (TB, L_pad) f32 (also the accumulator).
    k = pl.program_id(1)

    @pl.when(k == 0)
    def _():
        # Output block index is constant along k -> block stays resident in
        # VMEM and doubles as the f32 accumulator (no separate scratch).
        o_ref[...] = jnp.zeros_like(o_ref)

    # Cast on the VPU; free relative to HBM traffic, and avoids a separate
    # wrapper-side cast pass over x.
    # TODO(synk): a narrower x dtype (int8 on v5e/v6e, fp8-e4m3 on v7x) would
    # halve the dominant HBM read for true bag-of-words count inputs; not
    # applied here because the test feeds arbitrary floats.
    x_blk = x_ref[...].astype(jnp.bfloat16)

    if w_resident:
        # Whole W lives in VMEM (fetched exactly once for the entire grid);
        # slice out the k-th vocab chunk.
        start = pl.multiple_of(k * tk, tk)
        w_blk = w_ref[pl.ds(start, tk), :]
    else:
        w_blk = w_ref[...]

    o_ref[...] += jnp.dot(x_blk, w_blk, preferred_element_type=jnp.float32)

    @pl.when(k == pl.num_programs(1) - 1)
    def _():
        # Padded label columns carry bias = -1e30 -> exp() underflows to 0,
        # so they never perturb the normalizer over the real labels.
        logits = o_ref[...] + b_ref[...]                        # (TB, L_pad)
        m = jnp.max(logits, axis=-1, keepdims=True)             # (TB, 1)
        shifted = logits - m
        lse = jnp.log(jnp.sum(jnp.exp(shifted), axis=-1, keepdims=True))
        o_ref[...] = (shifted - lse).astype(o_ref.dtype)


def logistic_sentiment_classifier(x, w, b, *, block_batch=512,
                                  block_vocab=4096, vmem_limit_bytes=None):
    """x: (B, V), w: (V, L), b: (L,)  ->  (B, L) float32 log-probs."""
    B, V = x.shape
    V2, L = w.shape
    assert V == V2 and b.shape == (L,)

    # Lane-dense label axis (unmasked vst; full-width softmax lanes).
    L_pad = _round_up(L, _LANES)

    # Batch tile: multiple of 8 sublanes, capped by block_batch.  Keep >= 2
    # batch tiles when the batch is big enough so the "parallel" axis can be
    # split across the two TensorCores on v7x; harmless on single-TC v5e/v6e
    # given the ~0.35 us/step overhead.
    B8 = _round_up(B, _SUBLANES)
    TB = min(_round_up(block_batch, _SUBLANES), B8)
    if B8 // TB < 2 and B8 >= 2 * _SUBLANES:
        TB = _round_up(B8 // 2, _SUBLANES)
    B_pad = _round_up(B8, TB)

    # Vocab (reduction) tile: multiple of 128 lanes, capped by block_vocab.
    # Defaults keep the double-buffered working set well under the 32 MiB
    # scoped-VMEM default on every generation (incl. v7x's 64 MiB chip); on
    # v5e/v6e (128 MiB physical) pass bigger blocks + vmem_limit_bytes.
    TK = min(_round_up(block_vocab, _LANES), _round_up(V, _LANES))
    V_pad = _round_up(V, TK)

    # x: skip the extra HBM pad/cast pass entirely when already tile-aligned
    # (trace-time check); only ragged shapes build a padded bf16 copy.
    if B_pad == B and V_pad == V:
        x_in = x
    else:
        x_in = jnp.zeros((B_pad, V_pad), jnp.bfloat16).at[:B, :V].set(
            x.astype(jnp.bfloat16))

    # Parameters: padded/cast once per call.  Under jit with static parameters
    # this constant-folds; in a serving loop hoist it out of the hot path.
    w_p = jnp.zeros((V_pad, L_pad), jnp.bfloat16).at[:V, :L].set(
        w.astype(jnp.bfloat16))
    b_p = jnp.full((1, L_pad), _NEG_SENTINEL, dtype=jnp.float32).at[0, :L].set(
        b.astype(jnp.float32))

    # Resident W (fetched once) when it fits; otherwise tile along vocab
    # (re-fetched per batch tile; a large TB amortizes that).
    w_resident = (V_pad * L_pad * 2) <= _W_RESIDENT_MAX_BYTES
    if w_resident:
        w_spec = pl.BlockSpec((V_pad, L_pad), lambda i, k: (0, 0))
    else:
        w_spec = pl.BlockSpec((TK, L_pad), lambda i, k: (k, 0))

    grid = (B_pad // TB, V_pad // TK)

    cost = pl.CostEstimate(
        flops=2 * B_pad * V_pad * L_pad,
        transcendentals=2 * B_pad * L_pad,
        bytes_accessed=(x_in.size * x_in.dtype.itemsize + w_p.size * 2
                        + b_p.size * 4 + B_pad * L_pad * 4),
    )

    kernel = functools.partial(_logreg_kernel, tk=TK, w_resident=w_resident)

    out = pl.pallas_call(
        kernel,
        out_shape=jax.ShapeDtypeStruct((B_pad, L_pad), jnp.float32),
        grid=grid,
        in_specs=[
            pl.BlockSpec((TB, TK), lambda i, k: (i, k)),     # x tile
            w_spec,                                          # weights
            pl.BlockSpec((1, L_pad), lambda i, k: (0, 0)),   # bias, resident
        ],
        out_specs=pl.BlockSpec((TB, L_pad), lambda i, k: (i, 0)),
        compiler_params=pltpu.CompilerParams(
            dimension_semantics=("parallel", "arbitrary"),
            vmem_limit_bytes=vmem_limit_bytes,
        ),
        cost_estimate=cost,
    )(x_in, w_p, b_p)

    # TODO(synk): for tiny L the padded f32 write + slice is ~L_pad/L output
    # write amplification; return the padded block (or bf16 log-probs) if the
    # consumer can take it.  Output is small vs x for realistic vocab sizes.
    return out[:B, :L]


def _reference(x, w, b):
    # Same operand precision contract as the kernel: bf16 matmul operands,
    # f32 accumulation.
    logits = jnp.dot(
        x.astype(jnp.bfloat16), w.astype(jnp.bfloat16),
        preferred_element_type=jnp.float32,
    ) + b[None, :].astype(jnp.float32)
    return jax.nn.log_softmax(logits, axis=-1)


if __name__ == "__main__":
    key = jax.random.PRNGKey(0)
    kx, kw, kx2, kw2, kb2 = jax.random.split(key, 5)

    # ---- Main case: vocab=256, labels=8, batch=128 (aligned: no x copy,
    # resident W, two batch tiles for megacore) ----
    vocab_size, num_labels, batch = 256, 8, 128

    bound = 1.0 / np.sqrt(vocab_size)   # mirrors nn.init.uniform_(w, -1/sqrt(V), 1/sqrt(V))
    w = jax.random.uniform(kw, (vocab_size, num_labels), dtype=jnp.float32,
                           minval=-bound, maxval=bound)
    b = jnp.zeros((num_labels,), dtype=jnp.float32)   # torch.empty -> deterministic zeros
    x = jax.random.uniform(kx, (batch, vocab_size), dtype=jnp.float32)

    out = logistic_sentiment_classifier(x, w, b)
    out = jax.block_until_ready(out)
    ref = _reference(x, w, b)
    np.testing.assert_allclose(np.asarray(out), np.asarray(ref),
                               atol=1e-4, rtol=1e-4)

    # ---- Ragged case: exercises batch/vocab/label padding paths ----
    V2, L2, B2 = 300, 3, 5
    w2 = jax.random.uniform(kw2, (V2, L2), dtype=jnp.float32,
                            minval=-1.0 / np.sqrt(V2), maxval=1.0 / np.sqrt(V2))
    b2 = jax.random.normal(kb2, (L2,), dtype=jnp.float32) * 0.1
    x2 = jax.random.uniform(kx2, (B2, V2), dtype=jnp.float32)

    out2 = logistic_sentiment_classifier(x2, w2, b2)
    out2 = jax.block_until_ready(out2)
    ref2 = _reference(x2, w2, b2)
    np.testing.assert_allclose(np.asarray(out2), np.asarray(ref2),
                               atol=1e-4, rtol=1e-4)

    print("KERNEL_OK")
</pallas_src>

<mosaic_0001>
module attributes {stable_mosaic.version = 11 : i64} {
  func.func @_logreg_kernel(%arg0: i32, %arg1: i32, %arg2: memref<64x256xf32, #tpu.memory_space<vmem>>, %arg3: memref<256x128xbf16, #tpu.memory_space<vmem>>, %arg4: memref<1x128xf32, #tpu.memory_space<vmem>>, %arg5: memref<64x128xf32, #tpu.memory_space<vmem>>) attributes {dimension_semantics = [#tpu.dimension_semantics<parallel>, #tpu.dimension_semantics<arbitrary>], iteration_bounds = array<i64: 2, 1>, scalar_prefetch = 0 : i64, scratch_operands = 0 : i64, tpu.core_type = #tpu.core_type<tc>, window_params = [{transform_indices = @transform_0, window_bounds = array<i64: 64, 256>}, {pipeline_mode = #tpu.pipeline_mode<synchronous>, transform_indices = @transform_1, window_bounds = array<i64: 256, 128>}, {pipeline_mode = #tpu.pipeline_mode<synchronous>, transform_indices = @transform_2, window_bounds = array<i64: 1, 128>}, {transform_indices = @transform_3, window_bounds = array<i64: 64, 128>}]} {
    %c0_i32 = arith.constant 0 : i32
    %0 = arith.cmpi eq, %arg1, %c0_i32 : i32
    %1 = arith.extui %0 : i1 to i32
    %c0_i32_0 = arith.constant 0 : i32
    %2 = arith.cmpi ne, %1, %c0_i32_0 : i32
    scf.if %2 {
      %cst_9 = arith.constant 0.000000e+00 : f32
      %16 = vector.broadcast %cst_9 : f32 to vector<64x128xf32>
      %c0_10 = arith.constant 0 : index
      %c0_11 = arith.constant 0 : index
      %17 = vector.load %arg5[%c0_10, %c0_11] : memref<64x128xf32, #tpu.memory_space<vmem>>, vector<64x128xf32>
      tpu.vector_store %arg5[%c0_10, %c0_11], %16 {strides = array<i32>} : memref<64x128xf32, #tpu.memory_space<vmem>>, vector<64x128xf32>,
    } else {
    }
    %c0 = arith.constant 0 : index
    %c0_1 = arith.constant 0 : index
    %3 = vector.load %arg2[%c0, %c0_1] : memref<64x256xf32, #tpu.memory_space<vmem>>, vector<64x256xf32>
    %4 = arith.truncf %3 : vector<64x256xf32> to vector<64x256xbf16>
    %c256_i32 = arith.constant 256 : i32
    %5 = arith.muli %arg1, %c256_i32 : i32
    %6 = tpu.assume_multiple %5, 256 : i32
    %7 = arith.index_cast %6 : i32 to index
    %c0_2 = arith.constant 0 : index
    %8 = vector.load %arg3[%7, %c0_2] : memref<256x128xbf16, #tpu.memory_space<vmem>>, vector<256x128xbf16>
    %c0_3 = arith.constant 0 : index
    %c0_4 = arith.constant 0 : index
    %9 = vector.load %arg5[%c0_3, %c0_4] : memref<64x128xf32, #tpu.memory_space<vmem>>, vector<64x128xf32>
    %cst = arith.constant dense<0.000000e+00> : vector<64x128xf32>
    %10 = tpu.matmul %4, %8, %cst {dimension_numbers = #tpu.dot_dimension_numbers<[1], [0], [0], [1], [0, 0, 1, 1], [], []>} : vector<64x256xbf16>, vector<256x128xbf16>, vector<64x128xf32> -> vector<64x128xf32>
    %11 = arith.addf %9, %10 : vector<64x128xf32>
    %c0_5 = arith.constant 0 : index
    %c0_6 = arith.constant 0 : index
    %12 = vector.load %arg5[%c0_5, %c0_6] : memref<64x128xf32, #tpu.memory_space<vmem>>, vector<64x128xf32>
    tpu.vector_store %arg5[%c0_5, %c0_6], %11 {strides = array<i32>} : memref<64x128xf32, #tpu.memory_space<vmem>>, vector<64x128xf32>,
    %c0_i32_7 = arith.constant 0 : i32
    %13 = arith.cmpi eq, %arg1, %c0_i32_7 : i32
    %14 = arith.extui %13 : i1 to i32
    %c0_i32_8 = arith.constant 0 : i32
    %15 = arith.cmpi ne, %14, %c0_i32_8 : i32
    scf.if %15 {
      %c0_9 = arith.constant 0 : index
      %c0_10 = arith.constant 0 : index
      %16 = vector.load %arg5[%c0_9, %c0_10] : memref<64x128xf32, #tpu.memory_space<vmem>>, vector<64x128xf32>
      %c0_11 = arith.constant 0 : index
      %c0_12 = arith.constant 0 : index
      %17 = vector.load %arg4[%c0_11, %c0_12] : memref<1x128xf32, #tpu.memory_space<vmem>>, vector<1x128xf32>
      %18 = vector.broadcast %17 : vector<1x128xf32> to vector<64x128xf32>
      %19 = arith.addf %16, %18 : vector<64x128xf32>
      %cst_13 = arith.constant dense<0xFF800000> : vector<64xf32>
      %20 = vector.multi_reduction <maximumf>, %19, %cst_13 [1] : vector<64x128xf32> to vector<64xf32>
      %21 = vector.shape_cast %20 : vector<64xf32> to vector<64x1xf32>
      %22 = vector.broadcast %21 : vector<64x1xf32> to vector<64x128xf32>
      %23 = arith.subf %19, %22 : vector<64x128xf32>
      %24 = math.exp %23 : vector<64x128xf32>
      %cst_14 = arith.constant dense<0.000000e+00> : vector<64xf32>
      %25 = vector.multi_reduction <add>, %24, %cst_14 [1] : vector<64x128xf32> to vector<64xf32>
      %26 = vector.shape_cast %25 : vector<64xf32> to vector<64x1xf32>
      %27 = math.log %26 : vector<64x1xf32>
      %28 = vector.broadcast %27 : vector<64x1xf32> to vector<64x128xf32>
      %29 = arith.subf %23, %28 : vector<64x128xf32>
      %c0_15 = arith.constant 0 : index
      %c0_16 = arith.constant 0 : index
      %30 = vector.load %arg5[%c0_15, %c0_16] : memref<64x128xf32, #tpu.memory_space<vmem>>, vector<64x128xf32>
      tpu.vector_store %arg5[%c0_15, %c0_16], %29 {strides = array<i32>} : memref<64x128xf32, #tpu.memory_space<vmem>>, vector<64x128xf32>,
    } else {
    }
    return
  }
  func.func @transform_0(%arg0: i32, %arg1: i32) -> (i32, i32) {
    %c0_i32 = arith.constant 0 : i32
    return %arg0, %arg1 : i32, i32
  }
  func.func @transform_1(%arg0: i32, %arg1: i32) -> (i32, i32) {
    %c0_i32 = arith.constant 0 : i32
    %c0_i32_0 = arith.constant 0 : i32
    %c0_i32_1 = arith.constant 0 : i32
    return %c0_i32, %c0_i32_0 : i32, i32
  }
  func.func @transform_2(%arg0: i32, %arg1: i32) -> (i32, i32) {
    %c0_i32 = arith.constant 0 : i32
    %c0_i32_0 = arith.constant 0 : i32
    %c0_i32_1 = arith.constant 0 : i32
    return %c0_i32, %c0_i32_0 : i32, i32
  }
  func.func @transform_3(%arg0: i32, %arg1: i32) -> (i32, i32) {
    %c0_i32 = arith.constant 0 : i32
    %c0_i32_0 = arith.constant 0 : i32
    return %arg0, %c0_i32 : i32, i32
  }
}

</mosaic_0001>

<bundles_post_ra>
// kernel: tpu_custom_call.1
= control target key start
LH: loop header
LB: loop body
LE: loop exit
PB: predicated region body
PF: predicated region fallthrough
CT: control target
= control target key end

     0   :  { %s1309_s0 = inlined_call_operand.hbm [shape: f32[128,256], index: 0, kind: input, shape index: {}]   ;;  %s1310_s1 = inlined_call_operand.hbm [shape: bf16[256,128], index: 1, kind: input, shape index: {}]   ;;  %s1311_s2 = inlined_call_operand.vmem [shape: f32[1,128], index: 2, kind: input, shape index: {}]   ;;  %s1312_s3 = inlined_call_operand.hbm [shape: f32[128,128], index: 3, kind: output, shape index: {}]  }
   0x1   :  { %1313 = sst [smem:[#allocation11_spill]] %s1310_s1 }
   0x2   :  { %8 = vsyncpa [#allocation3], 0 }
   0x3   :  { %10 = vsyncpa [#allocation3 + $0x1], 0 }
   0x4   :  { %11 = vsyncpa [#allocation6], 0 }
   0x5   :  { %12 = vsyncpa [#allocation4], 0 }
   0x6   :  { %14 = vsyncpa [#allocation4 + $0x1], 0  ;;  %s1107_s12 = smov 0   ;;  %s1109_s13 = smov 0  }
   0x7   :  { %s1111_s14 = smov 0   ;;  %s1113_s15 = smov 0  }
   0x8   :  { %s1115_s16 = smov 0   ;;  %s1117_s17 = smov 0  }
   0x9 LB: > { %s702_s18 = sadd.s32 4294967295, %s1078_s17   ;;  %s703_s19 = sadd.s32 4294967294, %s1078_s17   ;;  %s1078_s17 = sphi %s1117_s17, %s20_s17   ;;  %s1074_s16 = sphi %s1115_s16, %s1326_s16   ;;  %s1070_s15 = sphi %s1113_s15, %s1325_s15   ;;  %s1066_s14 = sphi %s1111_s14, %s1324_s14   ;;  %s1062_s13 = sphi %s1109_s13, %s1323_s13   ;;  %s1058_s12 = sphi %s1107_s12, %s1322_s12  }
   0xa   : > { %p54_p0 = scmp.ne.s32.totalorder %s1062_s13, %s1058_s12  ;;  %p1141_p1 = scmp.eq.s32.totalorder %s702_s18, 0 }
   0xb   : > { %p1145_p2 = scmp.eq.s32.totalorder %s702_s18, 1  ;;  %p126_p3 = scmp.eq.s32.totalorder %s703_s19, 1 }
   0xc   : > { %p1151_p4 = por %p1141_p1, %p54_p0  ;;  %p704_p5 = scmp.ge.s32.totalorder %s1078_s17, 1 }
   0xd   : > { %p1156_p6 = por %p126_p3, %p54_p0  ;;  %p133_p7 = scmp.lt.s32.totalorder %s1078_s17, 3 }
   0xe   : > { %s1318_s1 = sld [smem:[#allocation11_spill]]  ;;  %s1080_s28 = smov [#allocation5]  }
   0xf   : > { %p1164_p8 = pnand %p704_p5, %p133_p7  ;;  %s146_s29 = sshll.u32 %s1080_s28, 4  ;;  %s147_s29 = int_to_ptr.vmem [resolvable:$true] %s146_s29 }
  0x10   : > { %p706_p11 = scmp.ge.s32.totalorder %s1078_s17, 2  ;;  %s1081_s30 = smov 64  }
  0x11   : > { %p827_p9 = pneg %p1164_p8  ;;  %s1082_s4 = smov 4  }
  0x12   : > { %s32_s5 = sadd.s32 1, %s1074_s16  ;;  %s41_s6 = sadd.s32 1, %s1066_s14 }
  0x13   : > { %p828_p10 = pnand %p827_p9, %p1141_p1  ;;  %p34_p12 = scmp.ge.s32.totalorder %s32_s5, 2 }
  0x14   : > { %s144_s26 = sshll.u32 %s1318_s1, 4  ;;  %p48_p13 = scmp.ne.s32.totalorder %s1066_s14, %s1062_s13  ;;  %s145_s26 = int_to_ptr.hbm [resolvable:$true] %s144_s26 }
  0x15   : > { %830 = dma.hbm_to_vmem [thread:$0]  (!%p828_p10), %s145_s26, 2048, %s147_s29, [#allocation6], %s1081_s30, %s1081_s30, %s1082_s4  }
  0x16   : > { %p49_p0 = scmp.eq.s32.totalorder %s1078_s17, 0  ;;  %s1328_s5 = smov (%p34_p12, %s32_s5), 0 }
  0x17   : > { %p1186_p5 = por %p1145_p2, %p48_p13  ;;  %s36_s9 = ssub.s32 %s1074_s16, %s1328_s5 }
  0x18   : > { %p1180_p3 = por %p49_p0, %p48_p13  ;;  %p840_p7 = scmp.lt.s32.totalorder %s1078_s17, 2 }
  0x19   : > { %p39_p9 = scmp.eq.s32.totalorder %s36_s9, 0  ;;  %s163_s10 = sand.u32 1, %s1066_s14  }
  0x1a   : > { %s707_s11 = sshll.u32 %s163_s10, 7  ;;  %s785_s19 = sshll.u32 %s1074_s16, 7 }
  0x1b   : > { %s1195_s18 = scalar_select %p39_p9, %s1066_s14, %s41_s6  }
  0x1c   : > { %s175_s26 = scalar_lea.hbm %s1309_s0, %s785_s19  ;;  %s167_s28 = scalar_lea.vmem [#allocation2], %s707_s11 }
  0x1d   : > { %s178_s29 = sshll.u32 %s167_s28, 4  ;;  %s176_s21 = sshll.u32 %s175_s26, 4  ;;  %s179_s29 = int_to_ptr.vmem [resolvable:$true] %s178_s29  ;;  %s177_s21 = int_to_ptr.hbm [resolvable:$true] %s176_s21 }
  0x1e   : > { %p832_p2 = pnand %p840_p7, %p1180_p3  ;;  %s164_s30 = scalar_lea.sflag [#allocation3], %s163_s10 }
  0x1f   : > { %s1083_s4 = smov 256   ;;  %s1084_s1 = smov 16  }
  0x20   : > { %834 = dma.hbm_to_vmem [thread:$0]  (!%p832_p2), %s177_s21, 2048, %s179_s29, %s164_s30, %s1083_s4, %s1083_s4, %s1084_s1  }
  0x21   : > { %190 = sbr.rel (%p1164_p8) target bundleno = 495 (0x1ef), region = 32  ;;  %s1206_s6 = sand.u32 (!%p1164_p8), 1, %s1062_s13  }
  0x22   : > { %s712_s9 = sshll.u32 (!%p1164_p8), %s1206_s6, 7  ;;  %s193_s11 = scalar_lea.sflag (!%p1164_p8), [#allocation3], %s1206_s6 }
  0x23   : > { %s1210_s19 = scalar_lea.vmem (!%p1164_p8), [#allocation2], %s712_s9 }
  0x26   : > { %1045 = dma.done.wait (%p1151_p4), %s193_s11, 2048  }
  0x27   : > { %1047 = vsyncadd (%p1151_p4), %s193_s11, 4294965248 }
  0x28   : > { %1049 = dma.done.wait (%p1141_p1), [#allocation6], 2048  }
  0x29   : > { %1051 = vsyncadd (%p1141_p1), [#allocation6], 4294965248  ;;  %v793_v0 = vld [vmem:[#allocation5 + $0x38] sm:$0xff]  ;;  %v792_v2 = vld [vmem:[#allocation5 + $0x30] sm:$0xff]  ;;  %s714_s22 = sshll.u32 %s1206_s6, 6  ;;  %s802_s7 = sshll.u32 %s1070_s15, 6 }
  0x2a   : > { %v801_v1 = vld [vmem:[#allocation5 + $0x78] sm:$0xff]  ;;  %405 = vmatpush.bf16.msra.mxu0 %v793_v0  ;;  %803 = vmatpush.bf16.msra.mxu2 %v793_v0  ;;  %v800_v3 = vld [vmem:[#allocation5 + $0x70] sm:$0xff]  ;;  %v791_v4 = vld [vmem:[#allocation5 + $0x28] sm:$0xff]  ;;  %s1255_s27 = scalar_lea.vmem [#allocation7], %s714_s22  ;;  %s602_s25 = scalar_lea.hbm %s1312_s3, %s802_s7 }
  0x2b   : > { %434 = vmatpush.bf16.msra.mxu1 %v801_v1  ;;  %811 = vmatpush.bf16.msra.mxu3 %v801_v1  ;;  %v799_v5 = vld [vmem:[#allocation5 + $0x68] sm:$0xff]  ;;  %v790_v6 = vld [vmem:[#allocation5 + $0x20] sm:$0xff]  ;;  %v789_v8 = vld [vmem:[#allocation5 + $0x18] sm:$0xff]  ;;  %s603_s26 = sshll.u32 %s1255_s27, 4  ;;  %s605_s28 = sshll.u32 %s602_s25, 4  ;;  %s604_s26 = int_to_ptr.vmem [resolvable:$true] %s603_s26  ;;  %s606_s28 = int_to_ptr.hbm [resolvable:$true] %s605_s28 }
  0x2c   : > { %v798_v7 = vld [vmem:[#allocation5 + $0x60] sm:$0xff]  ;;  %v797_v9 = vld [vmem:[#allocation5 + $0x58] sm:$0xff]  ;;  %v788_v10 = vld [vmem:[#allocation5 + $0x10] sm:$0xff]  ;;  %s591_s15 = scalar_lea.sflag [#allocation4], %s1206_s6  ;;  %s1006_s29 = sshra.s32 %s606_s28, 4  ;;  %s1007_s29 = int_to_ptr.hbm [resolvable:$true] %s1006_s29 }
  0x2d   : > { %v796_v11 = vld [vmem:[#allocation5 + $0x50] sm:$0xff]  ;;  %v787_v12 = vld [vmem:[#allocation5 + $0x8] sm:$0xff]  ;;  %v786_v14 = vld [vmem:[#allocation5] sm:$0xff]  ;;  %s1008_s21 = scalar_lea.hbm %s1007_s29, 64  ;;  %s1012_s9 = scalar_lea.hbm %s1312_s3, 128 }
  0x2e   : > { %406 = vmatpush.bf16.msra.mxu0 %v792_v2  ;;  %804 = vmatpush.bf16.msra.mxu2 %v792_v2  ;;  %v795_v13 = vld [vmem:[#allocation5 + $0x48] sm:$0xff]  ;;  %v794_v15 = vld [vmem:[#allocation5 + $0x40] sm:$0xff]  ;;  %v242_v17 = vld [vmem:[%s1210_s19 + $0x10] sm:$0xff]  ;;  %p1009_p1 = scmp.ne.s32.totalorder %s1007_s29, %s1008_s21  ;;  %p1013_p10 = scmp.lt.s32.totalorder %s1007_s29, %s1312_s3 }
  0x2f   : > { %435 = vmatpush.bf16.msra.mxu1 %v800_v3  ;;  %812 = vmatpush.bf16.msra.mxu3 %v800_v3  ;;  %v240_v16 = vld [vmem:[%s1210_s19] sm:$0xff]  ;;  %v250_v19 = vld [vmem:[%s1210_s19 + $0x50] sm:$0xff]  ;;  %v241_v20 = vld [vmem:[%s1210_s19 + $0x8] sm:$0xff]  ;;  %p1014_p12 = scmp.lt.s32.totalorder %s1012_s9, %s1008_s21 }
  0x30   : > { %v248_v18 = vld [vmem:[%s1210_s19 + $0x40] sm:$0xff]  ;;  %v243_v21 = vld [vmem:[%s1210_s19 + $0x18] sm:$0xff]  ;;  %v249_v22 = vld [vmem:[%s1210_s19 + $0x48] sm:$0xff]  ;;  %v256_v24 = vpack.c.bf16 %v242_v17, %v240_v16  ;;  %p1010_p4 = pnand %p1009_p1, %p1186_p5 }
  0x31   : > { %v251_v23 = vld [vmem:[%s1210_s19 + $0x58] sm:$0xff]  ;;  %v260_v25 = vpack.c.bf16 %v250_v19, %v248_v18  ;;  %v257_v26 = vpack.c.bf16 %v243_v21, %v241_v20  ;;  %v244_v28 = vld [vmem:[%s1210_s19 + $0x20] sm:$0xff]  ;;  %v246_v29 = vld [vmem:[%s1210_s19 + $0x30] sm:$0xff]  ;;  %p1015_p13 = por %p1014_p12, %p1013_p10 }
  0x32   : > { %407 = vmatpush.bf16.msra.mxu0 %v791_v4  ;;  %805 = vmatpush.bf16.msra.mxu2 %v791_v4  ;;  %v261_v27 = vpack.c.bf16 %v251_v23, %v249_v22  ;;  %v252_v30 = vld [vmem:[%s1210_s19 + $0x60] sm:$0xff]  ;;  %v254_v31 = vld [vmem:[%s1210_s19 + $0x70] sm:$0xff]  ;;  %v245_v32 = vld [vmem:[%s1210_s19 + $0x28] sm:$0xff]  ;;  %v258_v36 = vpack.c.bf16 %v246_v29, %v244_v28  ;;  %p1011_p8 = pneg %p1010_p4 }
  0x33   : > { %436 = vmatpush.bf16.msra.mxu1 %v799_v5  ;;  %813 = vmatpush.bf16.msra.mxu3 %v799_v5  ;;  %v247_v33 = vld [vmem:[%s1210_s19 + $0x38] sm:$0xff]  ;;  %v253_v34 = vld [vmem:[%s1210_s19 + $0x68] sm:$0xff]  ;;  %v262_v37 = vpack.c.bf16 %v254_v31, %v252_v30  ;;  %v899_v43 = vld [vmem:[%s1311_s2] ss:$0 sm:$0xff] }
  0x34   : > { %v255_v35 = vld [vmem:[%s1210_s19 + $0x78] sm:$0xff]  ;;  %v259_v38 = vpack.c.bf16 %v247_v33, %v245_v32  ;;  %p1016_p0 = pnand %p1015_p13, %p1011_p8 }
  0x35   : > { %v263_v39 = vpack.c.bf16 %v255_v35, %v253_v34 }
  0x36   : > { %408 = vmatpush.bf16.msra.mxu0 %v790_v6  ;;  %806 = vmatpush.bf16.msra.mxu2 %v790_v6 }
  0x37   : > { %437 = vmatpush.bf16.msra.mxu1 %v798_v7  ;;  %814 = vmatpush.bf16.msra.mxu3 %v798_v7 }
  0x3a   : > { %409 = vmatpush.bf16.msra.mxu0 %v789_v8  ;;  %807 = vmatpush.bf16.msra.mxu2 %v789_v8 }
  0x3b   : > { %438 = vmatpush.bf16.msra.mxu1 %v797_v9  ;;  %815 = vmatpush.bf16.msra.mxu3 %v797_v9 }
  0x3e   : > { %410 = vmatpush.bf16.msra.mxu0 %v788_v10  ;;  %808 = vmatpush.bf16.msra.mxu2 %v788_v10 }
  0x3f   : > { %439 = vmatpush.bf16.msra.mxu1 %v796_v11  ;;  %816 = vmatpush.bf16.msra.mxu3 %v796_v11 }
  0x42   : > { %411 = vmatpush.bf16.msra.mxu0 %v787_v12  ;;  %809 = vmatpush.bf16.msra.mxu2 %v787_v12 }
  0x43   : > { %440 = vmatpush.bf16.msra.mxu1 %v795_v13  ;;  %817 = vmatpush.bf16.msra.mxu3 %v795_v13 }
  0x46   : > { %412 = vmatpush.bf16.msra.mxu0 %v786_v14  ;;  %810 = vmatpush.bf16.msra.mxu2 %v786_v14 }
  0x47   : > { %441 = vmatpush.bf16.msra.mxu1 %v794_v15  ;;  %818 = vmatpush.bf16.msra.mxu3 %v794_v15 }
  0x49   : > { %413 = vmatmul.bf16.vlgmr.msra.gmra.mxu0 %v256_v24  ;;  %423 = vmatmul.bf16.vlgmr.msra.gmra.mxu2 %v260_v25 }
  0x4a   : > { %442 = vmatmul.bf16.vlgmr.msra.gmra.mxu1 %v257_v26  ;;  %452 = vmatmul.bf16.vlgmr.msra.gmra.mxu3 %v261_v27 }
  0x59   : > { %418 = vmatmul.bf16.gmra.mxu0 %v258_v36  ;;  %428 = vmatmul.bf16.gmra.mxu2 %v262_v37 }
  0x5a   : > { %447 = vmatmul.bf16.gmra.mxu1 %v259_v38  ;;  %457 = vmatmul.bf16.gmra.mxu3 %v263_v39 }
  0xc6   : > { %v414_v40 = vpop.f32.mrf.mxu0 }
  0xc7   : > { %v443_v41 = vpop.f32.mrf.mxu1 }
  0xc8   : > { %v444_v42 = vadd.f32 %v443_v41, %v414_v40 }
  0xca   : > { %v494_v45 = vadd.f32 %v899_v43, %v444_v42 }
  0xcc   : > { %v424_v44 = vpop.f32.mrf.mxu2  ;;  %502 = vmax.xlane.f32.xlu0 %v494_v45 }
  0xcd   : > { %v453_v46 = vpop.f32.mrf.mxu3 }
  0xce   : > { %v454_v47 = vadd.f32 %v453_v46, %v424_v44  ;;  %v416_v48 = vpop.f32.mrf.mxu0 }
  0xcf   : > { %v445_v49 = vpop.f32.mrf.mxu1 }
  0xd0   : > { %v446_v50 = vadd.f32 %v445_v49, %v416_v48  ;;  %v498_v51 = vadd.f32 %v899_v43, %v454_v47 }
  0xd2   : > { %510 = vmax.xlane.f32.xlu2 %v498_v51  ;;  %v495_v53 = vadd.f32 %v899_v43, %v446_v50 }
  0xd4   : > { %v426_v52 = vpop.f32.mrf.mxu2  ;;  %504 = vmax.xlane.f32.xlu0 %v495_v53 }
  0xd5   : > { %v455_v54 = vpop.f32.mrf.mxu3 }
  0xd6   : > { %v456_v55 = vadd.f32 %v455_v54, %v426_v52  ;;  %v419_v56 = vpop.f32.mrf.mxu0 }
  0xd7   : > { %v448_v57 = vpop.f32.mrf.mxu1 }
  0xd8   : > { %v449_v58 = vadd.f32 %v448_v57, %v419_v56  ;;  %v499_v59 = vadd.f32 %v899_v43, %v456_v55 }
  0xda   : > { %512 = vmax.xlane.f32.xlu2 %v499_v59  ;;  %v496_v61 = vadd.f32 %v899_v43, %v449_v58 }
  0xdc   : > { %v429_v60 = vpop.f32.mrf.mxu2  ;;  %506 = vmax.xlane.f32.xlu1 %v496_v61 }
  0xdd   : > { %v458_v62 = vpop.f32.mrf.mxu3 }
  0xde   : > { %v459_v63 = vadd.f32 %v458_v62, %v429_v60  ;;  %v421_v0 = vpop.f32.mrf.mxu0 }
  0xdf   : > { %v450_v1 = vpop.f32.mrf.mxu1 }
  0xe0   : > { %v451_v2 = vadd.f32 %v450_v1, %v421_v0  ;;  %v500_v3 = vadd.f32 %v899_v43, %v459_v63 }
  0xe2   : > { %514 = vmax.xlane.f32.xlu0 %v500_v3  ;;  %v497_v5 = vadd.f32 %v899_v43, %v451_v2 }
  0xe4   : > { %v431_v4 = vpop.f32.mrf.mxu2  ;;  %508 = vmax.xlane.f32.xlu1 %v497_v5 }
  0xe5   : > { %v460_v6 = vpop.f32.mrf.mxu3 }
  0xe6   : > { %v461_v7 = vadd.f32 %v460_v6, %v431_v4 }
  0xe8   : > { %v501_v8 = vadd.f32 %v899_v43, %v461_v7 }
  0xec   : > { %516 = vmax.xlane.f32.xlu1 %v501_v8 }
 0x13f   : > { %v503_v9 = vpop.xlane.xlu0 %502 }
 0x140   : > { %v518_v10 = vsub.f32 %v494_v45, %v503_v9 }
 0x142   : > { %v526_v11 = vmul.f32 1.442695, %v518_v10 }
 0x144   : > { %900 = vpow2.f32 %v526_v11 }
 0x145   : > { %v511_v12 = vpop.xlane.xlu2 %510 }
 0x146   : > { %v522_v13 = vsub.f32 %v498_v51, %v511_v12 }
 0x147   : > { %v505_v14 = vpop.xlane.xlu0 %504 }
 0x148   : > { %v534_v15 = vmul.f32 1.442695, %v522_v13  ;;  %v1239_v17 = vsub.f32 %v495_v53, %v505_v14 }
 0x14a   : > { %v901_v16 = vpop.eup %900  ;;  %902 = vpow2.f32 %v534_v15  ;;  %v528_v18 = vmul.f32 1.442695, %v1239_v17 }
 0x14b   : > { %542 = vadd.xlane.f32.xlu2 %v901_v16 }
 0x14c   : > { %904 = vpow2.f32 %v528_v18 }
 0x14d   : > { %v513_v21 = vpop.xlane.xlu2 %512 }
 0x14e   : > { %v1242_v24 = vsub.f32 %v499_v59, %v513_v21 }
 0x14f   : > { %v507_v19 = vpop.xlane.xlu1 %506 }
 0x150   : > { %v903_v20 = vpop.eup %902  ;;  %v520_v22 = vsub.f32 %v496_v61, %v507_v19  ;;  %v536_v25 = vmul.f32 1.442695, %v1242_v24 }
 0x151   : > { %550 = vadd.xlane.f32.xlu0 %v903_v20 }
 0x152   : > { %v530_v23 = vmul.f32 1.442695, %v520_v22  ;;  %v905_v27 = vpop.eup %904 }
 0x154   : > { %906 = vpow2.f32 %v530_v23 }
 0x155   : > { %v515_v28 = vpop.xlane.xlu0 %514  ;;  %908 = vpow2.f32 %v536_v25 }
 0x156   : > { %v1248_v32 = vsub.f32 %v500_v3, %v515_v28 }
 0x157   : > { %v509_v26 = vpop.xlane.xlu1 %508 }
 0x158   : > { %v1245_v29 = vsub.f32 %v497_v5, %v509_v26  ;;  %v538_v33 = vmul.f32 1.442695, %v1248_v32 }
 0x159   : > { %544 = vadd.xlane.f32.xlu0 %v905_v27 }
 0x15a   : > { %v907_v30 = vpop.eup %906  ;;  %v532_v31 = vmul.f32 1.442695, %v1245_v29 }
 0x15b   : > { %546 = vadd.xlane.f32.xlu1 %v907_v30  ;;  %v909_v36 = vpop.eup %908 }
 0x15c   : > { %910 = vpow2.f32 %v532_v31 }
 0x15d   : > { %912 = vpow2.f32 %v538_v33 }
 0x15f   : > { %v517_v34 = vpop.xlane.xlu1 %516 }
 0x160   : > { %v1251_v35 = vsub.f32 %v501_v8, %v517_v34 }
 0x162   : > { %v911_v37 = vpop.eup %910  ;;  %v540_v38 = vmul.f32 1.442695, %v1251_v35 }
 0x163   : > { %552 = vadd.xlane.f32.xlu1 %v909_v36  ;;  %548 = vadd.xlane.f32.xlu2 %v911_v37  ;;  %v913_v39 = vpop.eup %912 }
 0x164   : > { %914 = vpow2.f32 %v540_v38 }
 0x16a   : > { %v915_v40 = vpop.eup %914 }
 0x16b   : > { %556 = vadd.xlane.f32.xlu0 %v915_v40  ;;  %554 = vadd.xlane.f32.xlu2 %v913_v39 }
 0x1be   : > { %v543_v41 = vpop.xlane.xlu2 %542 }
 0x1bf   : > { %916 = vlog2.f32 %v543_v41 }
 0x1c4   : > { %v551_v42 = vpop.xlane.xlu0 %550 }
 0x1c5   : > { %v917_v43 = vpop.eup %916  ;;  %918 = vlog2.f32 %v551_v42 }
 0x1c6   : > { %v559_v44 = vmul.f32 0.6931472, %v917_v43 }
 0x1c8   : > { %v574_v45 = vsub.f32 %v518_v10, %v559_v44 }
 0x1ca   : > { %582 = vst [vmem:[%s1255_s27] sm:$0xff] %v574_v45 }
 0x1cb   : > { %v919_v46 = vpop.eup %918 }
 0x1cc   : > { %v567_v47 = vmul.f32 0.6931472, %v919_v46  ;;  %v545_v48 = vpop.xlane.xlu0 %544 }
 0x1cd   : > { %920 = vlog2.f32 %v545_v48 }
 0x1ce   : > { %v578_v49 = vsub.f32 %v522_v13, %v567_v47  ;;  %v547_v50 = vpop.xlane.xlu1 %546 }
 0x1cf   : > { %922 = vlog2.f32 %v547_v50 }
 0x1d0   : > { %586 = vst [vmem:[%s1255_s27 + $0x20] sm:$0xff] %v578_v49 }
 0x1d3   : > { %v921_v51 = vpop.eup %920 }
 0x1d4   : > { %v561_v52 = vmul.f32 0.6931472, %v921_v51 }
 0x1d5   : > { %v923_v53 = vpop.eup %922 }
 0x1d6   : > { %v575_v54 = vsub.f32 %v1239_v17, %v561_v52  ;;  %v563_v55 = vmul.f32 0.6931472, %v923_v53  ;;  %v553_v56 = vpop.xlane.xlu1 %552  ;;  %v549_v57 = vpop.xlane.xlu2 %548 }
 0x1d7   : > { %924 = vlog2.f32 %v553_v56 }
 0x1d8   : > { %583 = vst [vmem:[%s1255_s27 + $0x8] sm:$0xff] %v575_v54  ;;  %v576_v58 = vsub.f32 %v520_v22, %v563_v55  ;;  %926 = vlog2.f32 %v549_v57 }
 0x1da   : > { %584 = vst [vmem:[%s1255_s27 + $0x10] sm:$0xff] %v576_v58 }
 0x1dd   : > { %v925_v59 = vpop.eup %924 }
 0x1de   : > { %v927_v60 = vpop.eup %926  ;;  %v569_v61 = vmul.f32 0.6931472, %v925_v59  ;;  %v555_v62 = vpop.xlane.xlu2 %554 }
 0x1df   : > { %v557_v63 = vpop.xlane.xlu0 %556  ;;  %v565_v0 = vmul.f32 0.6931472, %v927_v60  ;;  %928 = vlog2.f32 %v555_v62 }
 0x1e0   : > { %v579_v1 = vsub.f32 %v1242_v24, %v569_v61  ;;  %930 = vlog2.f32 %v557_v63 }
 0x1e1   : > { %v577_v2 = vsub.f32 %v1245_v29, %v565_v0 }
 0x1e2   : > { %587 = vst [vmem:[%s1255_s27 + $0x28] sm:$0xff] %v579_v1 }
 0x1e3   : > { %585 = vst [vmem:[%s1255_s27 + $0x18] sm:$0xff] %v577_v2 }
 0x1e5   : > { %v929_v3 = vpop.eup %928 }
 0x1e6   : > { %v931_v4 = vpop.eup %930  ;;  %v571_v5 = vmul.f32 0.6931472, %v929_v3 }
 0x1e7   : > { %v573_v6 = vmul.f32 0.6931472, %v931_v4 }
 0x1e8   : > { %v580_v7 = vsub.f32 %v1248_v32, %v571_v5 }
 0x1e9   : > { %v581_v8 = vsub.f32 %v1251_v35, %v573_v6 }
 0x1ea   : > { %588 = vst [vmem:[%s1255_s27 + $0x30] sm:$0xff] %v580_v7 }
 0x1eb   : > { %589 = vst [vmem:[%s1255_s27 + $0x38] sm:$0xff] %v581_v8 }
 0x1ec   : > { %1019 = shalt.err (!%p1016_p0)
}
 0x1ed   : > { %s1085_s6 = smov 128   ;;  %s1086_s1 = smov 8  }
 0x1ee   : > { %825 = dma.vmem_to_hbm [thread:$0]  (%p1186_p5), %s604_s26, 1024, %s606_s28, %s591_s15, %s1085_s6, %s1085_s6, %s1086_s1  }
 0x1ef PF: > { %s620_s20 = sand.u32 1, %s1058_s12   ;;  %p836_p3 = pnand %p706_p11, %p1156_p6 }
 0x1f0   : > { %s621_s22 = scalar_lea.sflag [#allocation4], %s620_s20 }
 0x1f1   : > { %p837_p7 = pneg %p836_p3 }
 0x1f3   : > { %1053 = dma.done.wait (%p837_p7), %s621_s22, 1024  }
 0x1f4   : > { %1055 = vsyncadd (%p837_p7), %s621_s22, 4294966272  ;;  %s20_s17 = sadd.s32 1, %s1078_s17   ;;  %s1322_s12 = smov %s1062_s13 }
 0x1f5   : > { %p17_p9 = scmp.ge.s32.totalorder %s20_s17, 4   ;;  %s1323_s13 = smov %s1066_s14 }
 0x1f6   : > { %s1324_s14 = smov %s1195_s18  ;;  %s1325_s15 = smov %s1074_s16 }
 0x1f7   : > { %s1326_s16 = smov %s1328_s5  ;;  %19 = sbr.rel (!%p17_p9) target bundleno = 9 (0x9), region = 90 }
 0x1fc   :  { %627 = vsyncpa [#allocation3], 1 }
 0x1fd   :  { %629 = vsyncpa [#allocation3 + $0x1], 1 }
 0x1fe   :  { %630 = vsyncpa [#allocation6], 1 }
 0x1ff   :  { %631 = vsyncpa [#allocation4], 1 }
 0x200   :  { %633 = vsyncpa [#allocation4 + $0x1], 1 }

</bundles_post_ra>
